<compile_context>
chip_gen: v5e
topology: v5e:2x2
jax: 0.10.0
libtpu: 0.0.40
codegen_flags: <defaults>
</compile_context>

<pallas_src>
import jax
import jax.numpy as jnp
from jax.experimental import pallas as pl
from jax.experimental.pallas import tpu as pltpu


def _disc_cluster_kernel(c_ref, hpl_ref, hmi_ref, out_ref):
    # c_ref   : (1, n_h)        summary vector (grid-invariant block)
    # hpl_ref : (tile_r, n_h)   positive embeddings (row tile)
    # hmi_ref : (tile_r, n_h)   negative (shuffled) embeddings (row tile)
    # out_ref : (2, tile_r)     row 0 = diag(sc_1) tile, row 1 = diag(sc_2) tile
    n_h = hpl_ref.shape[-1]
    eps_tot = jnp.float32(n_h * 1e-8)  # sum_j (x_j^2 + 1e-8) == sum_j x_j^2 + n_h * 1e-8

    c = c_ref[...].astype(jnp.float32)        # (1, n_h)
    h_pl = hpl_ref[...].astype(jnp.float32)   # (tile_r, n_h)
    h_mi = hmi_ref[...].astype(jnp.float32)   # (tile_r, n_h)

    # Summary-vector inverse norm: computed once (hoisted), not once per row.
    inv_c = jax.lax.rsqrt(jnp.sum(c * c, axis=1, keepdims=True) + eps_tot)          # (1, 1)

    # Per-row inverse norms (rsqrt -> EUP; avoids the VPU sqrt+divide chain).
    inv_pl = jax.lax.rsqrt(jnp.sum(h_pl * h_pl, axis=1, keepdims=True) + eps_tot)   # (tile_r, 1)
    inv_mi = jax.lax.rsqrt(jnp.sum(h_mi * h_mi, axis=1, keepdims=True) + eps_tot)   # (tile_r, 1)

    # Row-wise dot products against the (implicitly broadcast) summary vector
    # == diagonal of h @ c_x.T in the reference.
    num_pl = jnp.sum(h_pl * c, axis=1, keepdims=True)   # (tile_r, 1)
    num_mi = jnp.sum(h_mi * c, axis=1, keepdims=True)   # (tile_r, 1)

    sc_1 = num_pl * inv_pl * inv_c   # (tile_r, 1)
    sc_2 = num_mi * inv_mi * inv_c   # (tile_r, 1)

    # Lane-dense stores through static ref slices (no concat temporary).
    out_ref[0:1, :] = sc_1.T         # (1, tile_r)
    out_ref[1:2, :] = sc_2.T         # (1, tile_r)


def _pick_row_tile(n_nb):
    # Largest lane-aligned row tile that divides n_nb; otherwise use the full
    # array as a single block (allowed because block dims == array dims).
    for t in (512, 256, 128):
        if n_nb % t == 0:
            return t
    return n_nb


def discriminator_cluster_forward(c, h_0, h_pl, h_mi, *, n_nb):
    """Pallas equivalent of Discriminator_cluster.forward.

    c    : (1, n_h)    summary vector (broadcast to h_0's shape in the reference)
    h_0  : (n_nb, n_h) only its shape matters (expand_as target)
    h_pl : (n_nb, n_h)
    h_mi : (n_nb, n_h)
    returns logits of shape (1, 2*n_nb), float32
    """
    del h_0  # only used for its shape, which equals h_pl/h_mi here
    n_h = h_pl.shape[-1]
    assert c.shape == (1, n_h)
    assert h_pl.shape == (n_nb, n_h) and h_mi.shape == (n_nb, n_h)

    tile_r = _pick_row_tile(n_nb)
    grid = (n_nb // tile_r,)

    out = pl.pallas_call(
        _disc_cluster_kernel,
        out_shape=jax.ShapeDtypeStruct((2, n_nb), jnp.float32),
        grid_spec=pl.GridSpec(
            grid=grid,
            in_specs=[
                pl.BlockSpec((1, n_h), lambda i: (0, 0)),        # summary vector (invariant)
                pl.BlockSpec((tile_r, n_h), lambda i: (i, 0)),   # h_pl row tile
                pl.BlockSpec((tile_r, n_h), lambda i: (i, 0)),   # h_mi row tile
            ],
            out_specs=pl.BlockSpec((2, tile_r), lambda i: (0, i)),
        ),
        compiler_params=pltpu.CompilerParams(
            dimension_semantics=("parallel",),  # rows independent -> 2-TC sharding on v7x
        ),
    )(c, h_pl, h_mi)  # native dtype in; upcast happens inside the kernel

    # logits = torch.cat((sc_1, sc_2), 0).view(1, -1)
    return out.reshape(1, 2 * n_nb)


def _reference_forward(c, h_0, h_pl, h_mi):
    """Pure-JAX re-statement of the PyTorch forward (for correctness check)."""
    def cos(x, y):
        frac_up = x @ y.T
        nx = jnp.sqrt(jnp.sum(x * x + 1e-8, axis=1))[:, None]
        ny = jnp.sqrt(jnp.sum(y * y + 1e-8, axis=1))[None, :]
        return frac_up / (nx * ny)

    c_x = jnp.broadcast_to(c, h_0.shape)
    sc_1 = jnp.diagonal(cos(h_pl, c_x))
    sc_2 = jnp.diagonal(cos(h_mi, c_x))
    return jnp.concatenate([sc_1, sc_2], axis=0).reshape(1, -1)


if __name__ == "__main__":
    # Small shapes consistent with the module: n_in = n_h = 32, n_nb = 8
    n_nb, n_h = 8, 32
    key = jax.random.PRNGKey(0)
    kc, k0, kp, km = jax.random.split(key, 4)
    c = jax.random.normal(kc, (1, n_h), dtype=jnp.float32)
    h_0 = jax.random.normal(k0, (n_nb, n_h), dtype=jnp.float32)
    h_pl = jax.random.normal(kp, (n_nb, n_h), dtype=jnp.float32)
    h_mi = jax.random.normal(km, (n_nb, n_h), dtype=jnp.float32)

    logits = discriminator_cluster_forward(c, h_0, h_pl, h_mi, n_nb=n_nb)
    logits = jax.block_until_ready(logits)

    ref = _reference_forward(c, h_0, h_pl, h_mi)
    assert logits.shape == (1, 2 * n_nb)
    assert jnp.allclose(logits, ref, atol=1e-5, rtol=1e-5), (logits, ref)

    print("KERNEL_OK")
</pallas_src>

<mosaic_0001>
module attributes {stable_mosaic.version = 11 : i64} {
  func.func @_disc_cluster_kernel(%arg0: i32, %arg1: memref<1x32xf32, #tpu.memory_space<vmem>>, %arg2: memref<8x32xf32, #tpu.memory_space<vmem>>, %arg3: memref<8x32xf32, #tpu.memory_space<vmem>>, %arg4: memref<2x8xf32, #tpu.memory_space<vmem>>) attributes {dimension_semantics = [#tpu.dimension_semantics<parallel>], iteration_bounds = array<i64: 1>, scalar_prefetch = 0 : i64, scratch_operands = 0 : i64, tpu.core_type = #tpu.core_type<tc>, window_params = [{pipeline_mode = #tpu.pipeline_mode<synchronous>, transform_indices = @transform_0, window_bounds = array<i64: 1, 32>}, {transform_indices = @transform_1, window_bounds = array<i64: 8, 32>}, {transform_indices = @transform_2, window_bounds = array<i64: 8, 32>}, {transform_indices = @transform_3, window_bounds = array<i64: 2, 8>}]} {
    %c0 = arith.constant 0 : index
    %c0_0 = arith.constant 0 : index
    %0 = vector.load %arg1[%c0, %c0_0] : memref<1x32xf32, #tpu.memory_space<vmem>>, vector<1x32xf32>
    %c0_1 = arith.constant 0 : index
    %c0_2 = arith.constant 0 : index
    %1 = vector.load %arg2[%c0_1, %c0_2] : memref<8x32xf32, #tpu.memory_space<vmem>>, vector<8x32xf32>
    %c0_3 = arith.constant 0 : index
    %c0_4 = arith.constant 0 : index
    %2 = vector.load %arg3[%c0_3, %c0_4] : memref<8x32xf32, #tpu.memory_space<vmem>>, vector<8x32xf32>
    %3 = arith.mulf %0, %0 : vector<1x32xf32>
    %cst = arith.constant dense<0.000000e+00> : vector<1xf32>
    %4 = vector.multi_reduction <add>, %3, %cst [1] : vector<1x32xf32> to vector<1xf32>
    %5 = vector.shape_cast %4 : vector<1xf32> to vector<1x1xf32>
    %cst_5 = arith.constant 3.200000e-07 : f32
    %6 = vector.broadcast %cst_5 : f32 to vector<1x1xf32>
    %7 = arith.addf %5, %6 : vector<1x1xf32>
    %8 = math.rsqrt %7 : vector<1x1xf32>
    %9 = arith.mulf %1, %1 : vector<8x32xf32>
    %cst_6 = arith.constant dense<0.000000e+00> : vector<8xf32>
    %10 = vector.multi_reduction <add>, %9, %cst_6 [1] : vector<8x32xf32> to vector<8xf32>
    %11 = vector.shape_cast %10 : vector<8xf32> to vector<8x1xf32>
    %cst_7 = arith.constant 3.200000e-07 : f32
    %12 = vector.broadcast %cst_7 : f32 to vector<8x1xf32>
    %13 = arith.addf %11, %12 : vector<8x1xf32>
    %14 = math.rsqrt %13 : vector<8x1xf32>
    %15 = arith.mulf %2, %2 : vector<8x32xf32>
    %cst_8 = arith.constant dense<0.000000e+00> : vector<8xf32>
    %16 = vector.multi_reduction <add>, %15, %cst_8 [1] : vector<8x32xf32> to vector<8xf32>
    %17 = vector.shape_cast %16 : vector<8xf32> to vector<8x1xf32>
    %cst_9 = arith.constant 3.200000e-07 : f32
    %18 = vector.broadcast %cst_9 : f32 to vector<8x1xf32>
    %19 = arith.addf %17, %18 : vector<8x1xf32>
    %20 = math.rsqrt %19 : vector<8x1xf32>
    %21 = vector.broadcast %0 : vector<1x32xf32> to vector<8x32xf32>
    %22 = arith.mulf %1, %21 : vector<8x32xf32>
    %cst_10 = arith.constant dense<0.000000e+00> : vector<8xf32>
    %23 = vector.multi_reduction <add>, %22, %cst_10 [1] : vector<8x32xf32> to vector<8xf32>
    %24 = vector.shape_cast %23 : vector<8xf32> to vector<8x1xf32>
    %25 = vector.broadcast %0 : vector<1x32xf32> to vector<8x32xf32>
    %26 = arith.mulf %2, %25 : vector<8x32xf32>
    %cst_11 = arith.constant dense<0.000000e+00> : vector<8xf32>
    %27 = vector.multi_reduction <add>, %26, %cst_11 [1] : vector<8x32xf32> to vector<8xf32>
    %28 = vector.shape_cast %27 : vector<8xf32> to vector<8x1xf32>
    %29 = arith.mulf %24, %14 : vector<8x1xf32>
    %30 = vector.broadcast %8 : vector<1x1xf32> to vector<8x1xf32>
    %31 = arith.mulf %29, %30 : vector<8x1xf32>
    %32 = arith.mulf %28, %20 : vector<8x1xf32>
    %33 = vector.broadcast %8 : vector<1x1xf32> to vector<8x1xf32>
    %34 = arith.mulf %32, %33 : vector<8x1xf32>
    %35 = tpu.transpose %31, [1, 0] : vector<8x1xf32> -> vector<1x8xf32>
    %c0_12 = arith.constant 0 : index
    %c0_13 = arith.constant 0 : index
    %36 = vector.load %arg4[%c0_12, %c0_13] : memref<2x8xf32, #tpu.memory_space<vmem>>, vector<1x8xf32>
    tpu.vector_store %arg4[%c0_12, %c0_13], %35 {strides = array<i32>} : memref<2x8xf32, #tpu.memory_space<vmem>>, vector<1x8xf32>,
    %37 = tpu.transpose %34, [1, 0] : vector<8x1xf32> -> vector<1x8xf32>
    %c1 = arith.constant 1 : index
    %c0_14 = arith.constant 0 : index
    %38 = vector.load %arg4[%c1, %c0_14] : memref<2x8xf32, #tpu.memory_space<vmem>>, vector<1x8xf32>
    tpu.vector_store %arg4[%c1, %c0_14], %37 {strides = array<i32>} : memref<2x8xf32, #tpu.memory_space<vmem>>, vector<1x8xf32>,
    return
  }
  func.func @transform_0(%arg0: i32) -> (i32, i32) {
    %c0_i32 = arith.constant 0 : i32
    %c0_i32_0 = arith.constant 0 : i32
    %c0_i32_1 = arith.constant 0 : i32
    return %c0_i32, %c0_i32_0 : i32, i32
  }
  func.func @transform_1(%arg0: i32) -> (i32, i32) {
    %c0_i32 = arith.constant 0 : i32
    %c0_i32_0 = arith.constant 0 : i32
    return %arg0, %c0_i32 : i32, i32
  }
  func.func @transform_2(%arg0: i32) -> (i32, i32) {
    %c0_i32 = arith.constant 0 : i32
    %c0_i32_0 = arith.constant 0 : i32
    return %arg0, %c0_i32 : i32, i32
  }
  func.func @transform_3(%arg0: i32) -> (i32, i32) {
    %c0_i32 = arith.constant 0 : i32
    %c0_i32_0 = arith.constant 0 : i32
    return %c0_i32, %arg0 : i32, i32
  }
}

</mosaic_0001>

<bundles_post_ra>
// kernel: tpu_custom_call.1
= control target key start
LH: loop header
LB: loop body
LE: loop exit
PB: predicated region body
PF: predicated region fallthrough
CT: control target
= control target key end

     0   :  { %8 = vsyncpa [#allocation3], 0  ;;  %s361_s0 = inlined_call_operand.hbm [shape: f32[1,32], index: 0, kind: input, shape index: {}]   ;;  %s362_s1 = inlined_call_operand.hbm [shape: f32[8,32], index: 1, kind: input, shape index: {}]   ;;  %s363_s2 = inlined_call_operand.hbm [shape: f32[8,32], index: 2, kind: input, shape index: {}]   ;;  %s364_s3 = inlined_call_operand.hbm [shape: f32[2,8], index: 3, kind: output, shape index: {}]  }
   0x1   :  { %9 = vsyncpa [#allocation6], 0  ;;  %s27_s14 = sshll.u32 %s362_s1, 4  ;;  %s28_s14 = int_to_ptr.hbm [resolvable:$true] %s27_s14 }
   0x2   :  { %10 = vsyncpa [#allocation4], 0  ;;  %s321_s15 = smov [#allocation5]   ;;  %s16_s19 = sshll.u32 %s361_s0, 4  ;;  %s17_s19 = int_to_ptr.hbm [resolvable:$true] %s16_s19 }
   0x3   :  { %s29_s16 = sshll.u32 %s321_s15, 4  ;;  %s322_s20 = smov [#allocation2]   ;;  %s30_s16 = int_to_ptr.vmem [resolvable:$true] %s29_s16 }
   0x4   :  { %32 = dma.hbm_to_vmem [thread:$0]  %s28_s14, 128, %s30_s16, [#allocation6]  }
   0x5   :  { %s18_s21 = sshll.u32 %s322_s20, 4  ;;  %s38_s24 = sshll.u32 %s363_s2, 4  ;;  %s19_s21 = int_to_ptr.vmem [resolvable:$true] %s18_s21  ;;  %s39_s24 = int_to_ptr.hbm [resolvable:$true] %s38_s24 }
   0x6   :  { %21 = dma.hbm_to_vmem [thread:$0]  %s17_s19, 16, %s19_s21, [#allocation3]  }
   0x7   :  { %s323_s1 = smov [#allocation7]  }
   0x8   :  { %s40_s25 = sshll.u32 %s323_s1, 4  ;;  %s41_s25 = int_to_ptr.vmem [resolvable:$true] %s40_s25 }
   0x9   :  { %43 = dma.hbm_to_vmem [thread:$0]  %s39_s24, 128, %s41_s25, [#allocation6]  }
   0xa   :  { %315 = dma.done.wait [#allocation3], 16  }
   0xb   :  { %316 = vsyncadd [#allocation3], 4294967280 }
   0xc   :  { %317 = dma.done.wait [#allocation6], 256  }
   0xd   :  { %318 = vsyncadd [#allocation6], 4294967040  ;;  %v58_v0 = vld [vmem:[#allocation7] sm:$0xff]  ;;  %vm76_vm0 = vcmask 261120   ;;  %v56_v1 = vld [vmem:[#allocation2] sm:$0x1] }
   0xe   :  { %vm60_vm1 = vcmask 253952   ;;  %v91_v2 = vmul.f32 %v58_v0, %v58_v0  ;;  %v59_v3 = vmul.f32 %v56_v1, %v56_v1  ;;  %v212_v4 = vld [vmem:[#allocation2] ss:$0 sm:$0xff]  ;;  %v57_v5 = vld [vmem:[#allocation5] sm:$0xff]  ;;  %vm154_vm11 = vcmask 57344   ;;  %s324_s0 = smov [#allocation8]  }
   0xf   :  { %v113_v8 = vmul.f32 %v212_v4, %v58_v0  ;;  %v75_v9 = vmul.f32 %v57_v5, %v57_v5  ;;  %v109_v11 = vmul.f32 %v212_v4, %v57_v5  ;;  %s194_s2 = sshll.u32 %s324_s0, 4  ;;  %s196_s28 = sshll.u32 %s364_s3, 4  ;;  %s195_s2 = int_to_ptr.vmem [resolvable:$true] %s194_s2  ;;  %s197_s28 = int_to_ptr.hbm [resolvable:$true] %s196_s28 }
  0x10   :  { %v92_v6 = vsel %vm76_vm0, %v91_v2, 0.0  ;;  %v61_v7 = vsel %vm60_vm1, %v59_v3, 0.0 }
  0x11   :  { %93 = vadd.xlane.f32.xlu1 %v92_v6  ;;  %62 = vadd.xlane.f32.xlu0 %v61_v7  ;;  %v114_v10 = vsel %vm76_vm0, %v113_v8, 0.0  ;;  %v77_v12 = vsel %vm76_vm0, %v75_v9, 0.0  ;;  %v110_v13 = vsel %vm76_vm0, %v109_v11, 0.0 }
  0x12   :  { %115 = vadd.xlane.f32.xlu2 %v114_v10 }
  0x19   :  { %78 = vadd.xlane.f32.xlu0 %v77_v12  ;;  %111 = vadd.xlane.f32.xlu1 %v110_v13 }
  0x84   :  { %v94_v14 = vpop.xlane.xlu1 %93  ;;  %v63_v15 = vpop.xlane.xlu0 %62 }
  0x85   :  { %v95_v16 = vadd.f32 3.2e-07, %v94_v14  ;;  %v64_v17 = vadd.f32 3.2e-07, %v63_v15  ;;  %v116_v33 = vpop.xlane.xlu2 %115 }
  0x87   :  { %213 = vrsqrt.f32 %v95_v16  ;;  %vm102_vm4 = vweird.f32 %v95_v16  ;;  %vm71_vm5 = vweird.f32 %v64_v17 }
  0x88   :  { %215 = vrsqrt.f32 %v64_v17 }
  0x8c   :  { %v79_v18 = vpop.xlane.xlu0 %78  ;;  %v112_v43 = vpop.xlane.xlu1 %111 }
  0x8d   :  { %v214_v19 = vpop.eup %213  ;;  %v80_v20 = vadd.f32 3.2e-07, %v79_v18 }
  0x8e   :  { %v216_v21 = vpop.eup %215  ;;  %v97_v22 = vmul.f32 %v214_v19, %v95_v16  ;;  %vm103_vm2 = vweird.f32 %v214_v19 }
  0x8f   :  { %v66_v23 = vmul.f32 %v216_v21, %v64_v17  ;;  %217 = vrsqrt.f32 %v80_v20  ;;  %vm72_vm3 = vweird.f32 %v216_v21  ;;  %vm104_vm6 = vmor %vm102_vm4, %vm103_vm2  ;;  %vm87_vm9 = vweird.f32 %v80_v20 }
  0x90   :  { %v98_v24 = vmul.f32 %v214_v19, %v97_v22  ;;  %vm73_vm7 = vmor %vm71_vm5, %vm72_vm3 }
  0x91   :  { %v67_v25 = vmul.f32 %v216_v21, %v66_v23 }
  0x92   :  { %v99_v26 = vmul.f32 0.5, %v98_v24 }
  0x93   :  { %v68_v27 = vmul.f32 0.5, %v67_v25 }
  0x94   :  { %v100_v28 = vsub.f32 1.5, %v99_v26 }
  0x95   :  { %v218_v29 = vpop.eup %217  ;;  %v69_v30 = vsub.f32 1.5, %v68_v27 }
  0x96   :  { %v82_v31 = vmul.f32 %v218_v29, %v80_v20  ;;  %v101_v32 = vmul.f32 %v214_v19, %v100_v28  ;;  %vm88_vm8 = vweird.f32 %v218_v29 }
  0x97   :  { %v70_v34 = vmul.f32 %v216_v21, %v69_v30  ;;  %vm89_vm10 = vmor %vm87_vm9, %vm88_vm8 }
  0x98   :  { %v83_v35 = vmul.f32 %v218_v29, %v82_v31  ;;  %v105_v36 = vsel %vm104_vm6, %v214_v19, %v101_v32 }
  0x99   :  { %v120_v37 = vmul.f32 %v116_v33, %v105_v36  ;;  %v74_v38 = vsel %vm73_vm7, %v216_v21, %v70_v34 }
  0x9a   :  { %v84_v39 = vmul.f32 0.5, %v83_v35  ;;  %v118_v40 = vperm.slane %v74_v38, 0 }
  0x9c   :  { %v121_v41 = vmul.f32 %v120_v37, %v118_v40  ;;  %v85_v42 = vsub.f32 1.5, %v84_v39 }
  0x9e   :  { %156 = vxpose.xlu0.b32.start.end [1/1] (short) (narrow) %v121_v41, 8  ;;  %v86_v44 = vmul.f32 %v218_v29, %v85_v42 }
  0xa0   :  { %v90_v45 = vsel %vm89_vm10, %v218_v29, %v86_v44 }
  0xa1   :  { %v117_v46 = vmul.f32 %v112_v43, %v90_v45 }
  0xa3   :  { %v119_v47 = vmul.f32 %v118_v40, %v117_v46 }
  0xa5   :  { %122 = vxpose.xlu2.b32.start.end [1/1] (short) (narrow) %v119_v47, 8 }
 0x13e   :  { %v138_v48 = vpop.trf.xlu2 }
 0x13f   :  { %155 = vst.msk [vmem:[#allocation8] sm:$0x1] %vm154_vm11, %v138_v48 }
 0x142   :  { %v172_v49 = vpop.trf.xlu0 }
 0x143   :  { %188 = vst.msk [vmem:[#allocation8 + $0x1] sm:$0x1] %vm154_vm11, %v172_v49 }
 0x144   :  { %199 = dma.vmem_to_hbm [thread:$0]  %s195_s2, 32, %s197_s28, [#allocation4]  }
 0x145   :  { %319 = dma.done.wait [#allocation4], 32  }
 0x146   :  { %320 = vsyncadd [#allocation4], 4294967264 }
 0x147   :  { %204 = vsyncpa [#allocation3], 1 }
 0x148   :  { %205 = vsyncpa [#allocation6], 1 }
 0x149   :  { %206 = vsyncpa [#allocation4], 1 }

</bundles_post_ra>
